<compile_context>
chip_gen: v7x
topology: tpu7x:2x2x1
jax: 0.10.0
libtpu: 0.0.40
codegen_flags: <defaults>
</compile_context>

<pallas_src>
import math
import functools

import jax
import jax.numpy as jnp
from jax import lax
from jax.experimental import pallas as pl
from jax.experimental.pallas import tpu as pltpu


# ----------------------------------------------------------------------------
# Fused kernel: projections + multi-head attention + output projection,
# single grid step, batch folded into rows.
# ----------------------------------------------------------------------------
def _fused_mha_kernel(k_ref, q_ref, v_ref, wq_ref, wk_ref, wv_ref,
                      fcw_ref, fcb_ref, o_ref,
                      q_scr, k_scr, v_scr, attn_scr,
                      *, batch, heads, d_k, sq, sk, scale):
    # One-shot bias-free projections for ALL batch rows at once.
    # Operands may be bf16; MXU accumulates in f32.  Scale folded into q.
    q_scr[...] = jnp.dot(q_ref[...], wq_ref[...],
                         preferred_element_type=jnp.float32) * scale
    k_scr[...] = jnp.dot(k_ref[...], wk_ref[...],
                         preferred_element_type=jnp.float32)
    v_scr[...] = jnp.dot(v_ref[...], wv_ref[...],
                         preferred_element_type=jnp.float32)

    # Per-(batch, head) attention, statically unrolled (B*H tiny tiles).
    # All slices are static (row, lane) offsets on VMEM scratch refs.
    for b in range(batch):
        rq = slice(b * sq, (b + 1) * sq)
        rk = slice(b * sk, (b + 1) * sk)
        for h in range(heads):
            cl = slice(h * d_k, (h + 1) * d_k)
            q_h = q_scr[rq, cl]          # [Sq, d_k] f32, pre-scaled
            k_h = k_scr[rk, cl]          # [Sk, d_k] f32
            v_h = v_scr[rk, cl]          # [Sk, d_k] f32

            # scores = q_h @ k_h^T, contracting last dims (no explicit k.T).
            s = lax.dot_general(q_h, k_h, (((1,), (1,)), ((), ())),
                                preferred_element_type=jnp.float32)
            # TODO(synk): optional boolean attention mask (masked_fill with
            # -1e20, applied before the row max) is not wired in; the module
            # is exercised with mask=None.
            m = jnp.max(s, axis=-1, keepdims=True)
            p = jnp.exp(s - m)
            p = p / jnp.sum(p, axis=-1, keepdims=True)   # exact normalization

            # Write this head's output straight to its static (row, lane)
            # offset of the merged [B*Sq, E] slab -- no register lane concat.
            attn_scr[rq, cl] = jnp.dot(p, v_h,
                                       preferred_element_type=jnp.float32)

    # Output projection (+bias) for all batches at once; single lane-dense
    # [B*Sq, E] store.  Bias is added after the f32 accumulation.
    out = jnp.dot(attn_scr[...].astype(fcw_ref.dtype), fcw_ref[...],
                  preferred_element_type=jnp.float32) + fcb_ref[...]
    o_ref[...] = out.astype(o_ref.dtype)


def fused_mha_forward(key_in, query, value, w_q, w_k, w_v, fc_w, fc_b, heads,
                      compute_dtype=jnp.bfloat16):
    """key_in/query/value: [B, S*, E]; weights [E, E]; bias [E] -> [B, Sq, E]."""
    B, Sk, E = key_in.shape
    Sq = query.shape[1]
    Sv = value.shape[1]
    assert Sk == Sv, "key/value sequence lengths must match (as in the reference)"
    assert E % heads == 0
    d_k = E // heads
    scale = 1.0 / math.sqrt(d_k)
    out_dtype = query.dtype

    # Fold batch into rows (contiguous reshape: free) and cast the HBM-resident
    # operands to the compute dtype (bf16 halves DMA bytes, doubles MXU rate).
    k2 = key_in.reshape(B * Sk, E).astype(compute_dtype)
    q2 = query.reshape(B * Sq, E).astype(compute_dtype)
    v2 = value.reshape(B * Sv, E).astype(compute_dtype)
    wq = w_q.astype(compute_dtype)
    wk = w_k.astype(compute_dtype)
    wv = w_v.astype(compute_dtype)
    fw = fc_w.astype(compute_dtype)
    fb = fc_b.reshape(1, E).astype(jnp.float32)   # added post f32 accumulation

    kernel = functools.partial(_fused_mha_kernel, batch=B, heads=heads,
                               d_k=d_k, sq=Sq, sk=Sk, scale=scale)

    # Advisory cost hint so XLA schedules surrounding ops sensibly.
    esz = jnp.dtype(compute_dtype).itemsize
    flops = 2 * B * ((Sk + Sq + Sv) * E * E        # Q/K/V projections
                     + heads * 2 * Sq * Sk * d_k   # scores + p @ v
                     + Sq * E * E)                 # fc_out
    bytes_accessed = (esz * (B * (Sk + Sq + Sv) * E + 4 * E * E)
                      + 4 * E
                      + jnp.dtype(out_dtype).itemsize * B * Sq * E)
    cost = pl.CostEstimate(flops=flops,
                           transcendentals=B * heads * Sq * Sk,
                           bytes_accessed=bytes_accessed)

    rows_q = B * Sq
    rows_k = B * Sk

    out2 = pl.pallas_call(
        kernel,
        out_shape=jax.ShapeDtypeStruct((rows_q, E), out_dtype),
        grid=(1,),   # single step: per-step overhead paid exactly once
        in_specs=[
            pl.BlockSpec((rows_k, E), lambda i: (0, 0)),   # key   [B*Sk, E]
            pl.BlockSpec((rows_q, E), lambda i: (0, 0)),   # query [B*Sq, E]
            pl.BlockSpec((rows_k, E), lambda i: (0, 0)),   # value [B*Sv, E]
            pl.BlockSpec((E, E), lambda i: (0, 0)),        # w_q
            pl.BlockSpec((E, E), lambda i: (0, 0)),        # w_k
            pl.BlockSpec((E, E), lambda i: (0, 0)),        # w_v
            pl.BlockSpec((E, E), lambda i: (0, 0)),        # fc_w
            pl.BlockSpec((1, E), lambda i: (0, 0)),        # fc_b
        ],
        out_specs=pl.BlockSpec((rows_q, E), lambda i: (0, 0)),
        scratch_shapes=[
            pltpu.VMEM((rows_q, E), jnp.float32),   # projected q (pre-scaled)
            pltpu.VMEM((rows_k, E), jnp.float32),   # projected k
            pltpu.VMEM((rows_k, E), jnp.float32),   # projected v
            pltpu.VMEM((rows_q, E), jnp.float32),   # merged head outputs
        ],
        compiler_params=pltpu.CompilerParams(
            dimension_semantics=("arbitrary",)),
        cost_estimate=cost,
    )(k2, q2, v2, wq, wk, wv, fw, fb)

    return out2.reshape(B, Sq, E)


# ----------------------------------------------------------------------------
# Module wrapper (parameter setup)
# ----------------------------------------------------------------------------
class MultiHeadAttentionPallas:
    def __init__(self, embed_dim=64, heads=4, rng_key=None):
        assert embed_dim % heads == 0
        self.embed_dim = embed_dim
        self.heads = heads
        self.d_k = embed_dim // heads

        if rng_key is None:
            rng_key = jax.random.PRNGKey(0)
        k1, k2, k3, k4, k5 = jax.random.split(rng_key, 5)
        bound = 1.0 / math.sqrt(embed_dim)
        # Weights stored as [in, out] (transposed PyTorch nn.Linear.weight).
        init = lambda k: jax.random.uniform(
            k, (embed_dim, embed_dim), jnp.float32, -bound, bound)
        self.w_q = init(k1)
        self.w_k = init(k2)
        self.w_v = init(k3)
        self.fc_w = init(k4)
        self.fc_b = jax.random.uniform(k5, (embed_dim,), jnp.float32, -bound, bound)

    def __call__(self, key_in, query, value, mask=None,
                 compute_dtype=jnp.bfloat16):
        assert mask is None  # TODO(synk): mask path not implemented (see kernel)
        return fused_mha_forward(key_in, query, value,
                                 self.w_q, self.w_k, self.w_v,
                                 self.fc_w, self.fc_b, self.heads,
                                 compute_dtype=compute_dtype)


# ----------------------------------------------------------------------------
# Pure-JAX reference for verification (f32 throughout)
# ----------------------------------------------------------------------------
def reference_forward(m, key_in, query, value):
    B, Sk, E = key_in.shape
    Sq = query.shape[1]
    H, d = m.heads, m.d_k
    k = key_in @ m.w_k
    q = query @ m.w_q
    v = value @ m.w_v
    split = lambda x: x.reshape(B, -1, H, d).transpose(0, 2, 1, 3)
    q, k, v = split(q), split(k), split(v)
    scores = jnp.einsum('bhqd,bhkd->bhqk', q, k) / math.sqrt(d)
    p = jax.nn.softmax(scores, axis=-1)
    out = jnp.einsum('bhqk,bhkd->bhqd', p, v)
    out = out.transpose(0, 2, 1, 3).reshape(B, Sq, E)
    return out @ m.fc_w + m.fc_b


if __name__ == "__main__":
    B, S, E, H = 2, 8, 64, 4  # batch=2, seq=8, embed_dim=64, heads=4 (d_k=16)

    root = jax.random.PRNGKey(0)
    kp, kk, kq, kv = jax.random.split(root, 4)

    mha = MultiHeadAttentionPallas(embed_dim=E, heads=H, rng_key=kp)

    key_in = jax.random.normal(kk, (B, S, E), jnp.float32)
    query = jax.random.normal(kq, (B, S, E), jnp.float32)
    value = jax.random.normal(kv, (B, S, E), jnp.float32)

    ref = reference_forward(mha, key_in, query, value)

    # f32 compute path: bit-for-bit-level parity with the f32 reference.
    out_f32 = jax.block_until_ready(
        mha(key_in, query, value, compute_dtype=jnp.float32))
    assert out_f32.shape == (B, S, E)
    err_f32 = jnp.max(jnp.abs(out_f32 - ref))
    assert jnp.allclose(out_f32, ref, atol=1e-4, rtol=1e-4), \
        f"f32 path max abs err {err_f32}"

    # bf16 operand path (default, the performance configuration): tolerance
    # covers bf16 rounding of the HBM-resident operands; accumulation is f32.
    out_bf16 = jax.block_until_ready(mha(key_in, query, value))
    assert out_bf16.shape == (B, S, E)
    err_bf16 = jnp.max(jnp.abs(out_bf16 - ref))
    assert jnp.allclose(out_bf16, ref, atol=3e-2, rtol=3e-2), \
        f"bf16 path max abs err {err_bf16}"

    print("KERNEL_OK")
</pallas_src>

<mosaic_0001>
module attributes {stable_mosaic.version = 11 : i64} {
  func.func @_fused_mha_kernel(%arg0: i32, %arg1: memref<16x64xf32, #tpu.memory_space<vmem>>, %arg2: memref<16x64xf32, #tpu.memory_space<vmem>>, %arg3: memref<16x64xf32, #tpu.memory_space<vmem>>, %arg4: memref<64x64xf32, #tpu.memory_space<vmem>>, %arg5: memref<64x64xf32, #tpu.memory_space<vmem>>, %arg6: memref<64x64xf32, #tpu.memory_space<vmem>>, %arg7: memref<64x64xf32, #tpu.memory_space<vmem>>, %arg8: memref<1x64xf32, #tpu.memory_space<vmem>>, %arg9: memref<16x64xf32, #tpu.memory_space<vmem>>, %arg10: memref<16x64xf32, #tpu.memory_space<vmem>>, %arg11: memref<16x64xf32, #tpu.memory_space<vmem>>, %arg12: memref<16x64xf32, #tpu.memory_space<vmem>>, %arg13: memref<16x64xf32, #tpu.memory_space<vmem>>) attributes {dimension_semantics = [#tpu.dimension_semantics<arbitrary>], iteration_bounds = array<i64: 1>, scalar_prefetch = 0 : i64, scratch_operands = 4 : i64, tpu.core_type = #tpu.core_type<tc>, window_params = [{pipeline_mode = #tpu.pipeline_mode<synchronous>, transform_indices = @transform_0, window_bounds = array<i64: 16, 64>}, {pipeline_mode = #tpu.pipeline_mode<synchronous>, transform_indices = @transform_1, window_bounds = array<i64: 16, 64>}, {pipeline_mode = #tpu.pipeline_mode<synchronous>, transform_indices = @transform_2, window_bounds = array<i64: 16, 64>}, {pipeline_mode = #tpu.pipeline_mode<synchronous>, transform_indices = @transform_3, window_bounds = array<i64: 64, 64>}, {pipeline_mode = #tpu.pipeline_mode<synchronous>, transform_indices = @transform_4, window_bounds = array<i64: 64, 64>}, {pipeline_mode = #tpu.pipeline_mode<synchronous>, transform_indices = @transform_5, window_bounds = array<i64: 64, 64>}, {pipeline_mode = #tpu.pipeline_mode<synchronous>, transform_indices = @transform_6, window_bounds = array<i64: 64, 64>}, {pipeline_mode = #tpu.pipeline_mode<synchronous>, transform_indices = @transform_7, window_bounds = array<i64: 1, 64>}, {pipeline_mode = #tpu.pipeline_mode<synchronous>, transform_indices = @transform_8, window_bounds = array<i64: 16, 64>}]} {
    %c0 = arith.constant 0 : index
    %c0_0 = arith.constant 0 : index
    %0 = vector.load %arg2[%c0, %c0_0] : memref<16x64xf32, #tpu.memory_space<vmem>>, vector<16x64xf32>
    %c0_1 = arith.constant 0 : index
    %c0_2 = arith.constant 0 : index
    %1 = vector.load %arg4[%c0_1, %c0_2] : memref<64x64xf32, #tpu.memory_space<vmem>>, vector<64x64xf32>
    %cst = arith.constant dense<0.000000e+00> : vector<16x64xf32>
    %2 = tpu.matmul %0, %1, %cst {dimension_numbers = #tpu.dot_dimension_numbers<[1], [0], [0], [1], [0, 0, 1, 1], [], []>} : vector<16x64xf32>, vector<64x64xf32>, vector<16x64xf32> -> vector<16x64xf32>
    %cst_3 = arith.constant 2.500000e-01 : f32
    %3 = vector.broadcast %cst_3 : f32 to vector<16x64xf32>
    %4 = arith.mulf %2, %3 : vector<16x64xf32>
    %c0_4 = arith.constant 0 : index
    %c0_5 = arith.constant 0 : index
    %5 = vector.load %arg10[%c0_4, %c0_5] : memref<16x64xf32, #tpu.memory_space<vmem>>, vector<16x64xf32>
    tpu.vector_store %arg10[%c0_4, %c0_5], %4 {strides = array<i32>} : memref<16x64xf32, #tpu.memory_space<vmem>>, vector<16x64xf32>,
    %c0_6 = arith.constant 0 : index
    %c0_7 = arith.constant 0 : index
    %6 = vector.load %arg1[%c0_6, %c0_7] : memref<16x64xf32, #tpu.memory_space<vmem>>, vector<16x64xf32>
    %c0_8 = arith.constant 0 : index
    %c0_9 = arith.constant 0 : index
    %7 = vector.load %arg5[%c0_8, %c0_9] : memref<64x64xf32, #tpu.memory_space<vmem>>, vector<64x64xf32>
    %cst_10 = arith.constant dense<0.000000e+00> : vector<16x64xf32>
    %8 = tpu.matmul %6, %7, %cst_10 {dimension_numbers = #tpu.dot_dimension_numbers<[1], [0], [0], [1], [0, 0, 1, 1], [], []>} : vector<16x64xf32>, vector<64x64xf32>, vector<16x64xf32> -> vector<16x64xf32>
    %c0_11 = arith.constant 0 : index
    %c0_12 = arith.constant 0 : index
    %9 = vector.load %arg11[%c0_11, %c0_12] : memref<16x64xf32, #tpu.memory_space<vmem>>, vector<16x64xf32>
    tpu.vector_store %arg11[%c0_11, %c0_12], %8 {strides = array<i32>} : memref<16x64xf32, #tpu.memory_space<vmem>>, vector<16x64xf32>,
    %c0_13 = arith.constant 0 : index
    %c0_14 = arith.constant 0 : index
    %10 = vector.load %arg3[%c0_13, %c0_14] : memref<16x64xf32, #tpu.memory_space<vmem>>, vector<16x64xf32>
    %c0_15 = arith.constant 0 : index
    %c0_16 = arith.constant 0 : index
    %11 = vector.load %arg6[%c0_15, %c0_16] : memref<64x64xf32, #tpu.memory_space<vmem>>, vector<64x64xf32>
    %cst_17 = arith.constant dense<0.000000e+00> : vector<16x64xf32>
    %12 = tpu.matmul %10, %11, %cst_17 {dimension_numbers = #tpu.dot_dimension_numbers<[1], [0], [0], [1], [0, 0, 1, 1], [], []>} : vector<16x64xf32>, vector<64x64xf32>, vector<16x64xf32> -> vector<16x64xf32>
    %c0_18 = arith.constant 0 : index
    %c0_19 = arith.constant 0 : index
    %13 = vector.load %arg12[%c0_18, %c0_19] : memref<16x64xf32, #tpu.memory_space<vmem>>, vector<16x64xf32>
    tpu.vector_store %arg12[%c0_18, %c0_19], %12 {strides = array<i32>} : memref<16x64xf32, #tpu.memory_space<vmem>>, vector<16x64xf32>,
    %c0_20 = arith.constant 0 : index
    %c0_21 = arith.constant 0 : index
    %14 = vector.load %arg10[%c0_20, %c0_21] : memref<16x64xf32, #tpu.memory_space<vmem>>, vector<8x16xf32>
    %c0_22 = arith.constant 0 : index
    %c0_23 = arith.constant 0 : index
    %15 = vector.load %arg11[%c0_22, %c0_23] : memref<16x64xf32, #tpu.memory_space<vmem>>, vector<8x16xf32>
    %c0_24 = arith.constant 0 : index
    %c0_25 = arith.constant 0 : index
    %16 = vector.load %arg12[%c0_24, %c0_25] : memref<16x64xf32, #tpu.memory_space<vmem>>, vector<8x16xf32>
    %cst_26 = arith.constant dense<0.000000e+00> : vector<8x8xf32>
    %17 = tpu.matmul %14, %15, %cst_26 {dimension_numbers = #tpu.dot_dimension_numbers<[1], [1], [0], [0], [0, 0, 1, 0], [], []>} : vector<8x16xf32>, vector<8x16xf32>, vector<8x8xf32> -> vector<8x8xf32>
    %cst_27 = arith.constant dense<0xFF800000> : vector<8xf32>
    %18 = vector.multi_reduction <maximumf>, %17, %cst_27 [1] : vector<8x8xf32> to vector<8xf32>
    %19 = vector.shape_cast %18 : vector<8xf32> to vector<8x1xf32>
    %20 = vector.broadcast %19 : vector<8x1xf32> to vector<8x8xf32>
    %21 = arith.subf %17, %20 : vector<8x8xf32>
    %22 = math.exp %21 : vector<8x8xf32>
    %cst_28 = arith.constant dense<0.000000e+00> : vector<8xf32>
    %23 = vector.multi_reduction <add>, %22, %cst_28 [1] : vector<8x8xf32> to vector<8xf32>
    %24 = vector.shape_cast %23 : vector<8xf32> to vector<8x1xf32>
    %25 = vector.broadcast %24 : vector<8x1xf32> to vector<8x8xf32>
    %26 = arith.divf %22, %25 : vector<8x8xf32>
    %cst_29 = arith.constant dense<0.000000e+00> : vector<8x16xf32>
    %27 = tpu.matmul %26, %16, %cst_29 {dimension_numbers = #tpu.dot_dimension_numbers<[1], [0], [0], [1], [0, 0, 1, 1], [], []>} : vector<8x8xf32>, vector<8x16xf32>, vector<8x16xf32> -> vector<8x16xf32>
    %c0_30 = arith.constant 0 : index
    %c0_31 = arith.constant 0 : index
    %28 = vector.load %arg13[%c0_30, %c0_31] : memref<16x64xf32, #tpu.memory_space<vmem>>, vector<8x16xf32>
    tpu.vector_store %arg13[%c0_30, %c0_31], %27 {strides = array<i32>} : memref<16x64xf32, #tpu.memory_space<vmem>>, vector<8x16xf32>,
    %c0_32 = arith.constant 0 : index
    %c16 = arith.constant 16 : index
    %29 = vector.load %arg10[%c0_32, %c16] : memref<16x64xf32, #tpu.memory_space<vmem>>, vector<8x16xf32>
    %c0_33 = arith.constant 0 : index
    %c16_34 = arith.constant 16 : index
    %30 = vector.load %arg11[%c0_33, %c16_34] : memref<16x64xf32, #tpu.memory_space<vmem>>, vector<8x16xf32>
    %c0_35 = arith.constant 0 : index
    %c16_36 = arith.constant 16 : index
    %31 = vector.load %arg12[%c0_35, %c16_36] : memref<16x64xf32, #tpu.memory_space<vmem>>, vector<8x16xf32>
    %cst_37 = arith.constant dense<0.000000e+00> : vector<8x8xf32>
    %32 = tpu.matmul %29, %30, %cst_37 {dimension_numbers = #tpu.dot_dimension_numbers<[1], [1], [0], [0], [0, 0, 1, 0], [], []>} : vector<8x16xf32>, vector<8x16xf32>, vector<8x8xf32> -> vector<8x8xf32>
    %cst_38 = arith.constant dense<0xFF800000> : vector<8xf32>
    %33 = vector.multi_reduction <maximumf>, %32, %cst_38 [1] : vector<8x8xf32> to vector<8xf32>
    %34 = vector.shape_cast %33 : vector<8xf32> to vector<8x1xf32>
    %35 = vector.broadcast %34 : vector<8x1xf32> to vector<8x8xf32>
    %36 = arith.subf %32, %35 : vector<8x8xf32>
    %37 = math.exp %36 : vector<8x8xf32>
    %cst_39 = arith.constant dense<0.000000e+00> : vector<8xf32>
    %38 = vector.multi_reduction <add>, %37, %cst_39 [1] : vector<8x8xf32> to vector<8xf32>
    %39 = vector.shape_cast %38 : vector<8xf32> to vector<8x1xf32>
    %40 = vector.broadcast %39 : vector<8x1xf32> to vector<8x8xf32>
    %41 = arith.divf %37, %40 : vector<8x8xf32>
    %cst_40 = arith.constant dense<0.000000e+00> : vector<8x16xf32>
    %42 = tpu.matmul %41, %31, %cst_40 {dimension_numbers = #tpu.dot_dimension_numbers<[1], [0], [0], [1], [0, 0, 1, 1], [], []>} : vector<8x8xf32>, vector<8x16xf32>, vector<8x16xf32> -> vector<8x16xf32>
    %c0_41 = arith.constant 0 : index
    %c16_42 = arith.constant 16 : index
    %43 = vector.load %arg13[%c0_41, %c16_42] : memref<16x64xf32, #tpu.memory_space<vmem>>, vector<8x16xf32>
    tpu.vector_store %arg13[%c0_41, %c16_42], %42 {strides = array<i32>} : memref<16x64xf32, #tpu.memory_space<vmem>>, vector<8x16xf32>,
    %c0_43 = arith.constant 0 : index
    %c32 = arith.constant 32 : index
    %44 = vector.load %arg10[%c0_43, %c32] : memref<16x64xf32, #tpu.memory_space<vmem>>, vector<8x16xf32>
    %c0_44 = arith.constant 0 : index
    %c32_45 = arith.constant 32 : index
    %45 = vector.load %arg11[%c0_44, %c32_45] : memref<16x64xf32, #tpu.memory_space<vmem>>, vector<8x16xf32>
    %c0_46 = arith.constant 0 : index
    %c32_47 = arith.constant 32 : index
    %46 = vector.load %arg12[%c0_46, %c32_47] : memref<16x64xf32, #tpu.memory_space<vmem>>, vector<8x16xf32>
    %cst_48 = arith.constant dense<0.000000e+00> : vector<8x8xf32>
    %47 = tpu.matmul %44, %45, %cst_48 {dimension_numbers = #tpu.dot_dimension_numbers<[1], [1], [0], [0], [0, 0, 1, 0], [], []>} : vector<8x16xf32>, vector<8x16xf32>, vector<8x8xf32> -> vector<8x8xf32>
    %cst_49 = arith.constant dense<0xFF800000> : vector<8xf32>
    %48 = vector.multi_reduction <maximumf>, %47, %cst_49 [1] : vector<8x8xf32> to vector<8xf32>
    %49 = vector.shape_cast %48 : vector<8xf32> to vector<8x1xf32>
    %50 = vector.broadcast %49 : vector<8x1xf32> to vector<8x8xf32>
    %51 = arith.subf %47, %50 : vector<8x8xf32>
    %52 = math.exp %51 : vector<8x8xf32>
    %cst_50 = arith.constant dense<0.000000e+00> : vector<8xf32>
    %53 = vector.multi_reduction <add>, %52, %cst_50 [1] : vector<8x8xf32> to vector<8xf32>
    %54 = vector.shape_cast %53 : vector<8xf32> to vector<8x1xf32>
    %55 = vector.broadcast %54 : vector<8x1xf32> to vector<8x8xf32>
    %56 = arith.divf %52, %55 : vector<8x8xf32>
    %cst_51 = arith.constant dense<0.000000e+00> : vector<8x16xf32>
    %57 = tpu.matmul %56, %46, %cst_51 {dimension_numbers = #tpu.dot_dimension_numbers<[1], [0], [0], [1], [0, 0, 1, 1], [], []>} : vector<8x8xf32>, vector<8x16xf32>, vector<8x16xf32> -> vector<8x16xf32>
    %c0_52 = arith.constant 0 : index
    %c32_53 = arith.constant 32 : index
    %58 = vector.load %arg13[%c0_52, %c32_53] : memref<16x64xf32, #tpu.memory_space<vmem>>, vector<8x16xf32>
    tpu.vector_store %arg13[%c0_52, %c32_53], %57 {strides = array<i32>} : memref<16x64xf32, #tpu.memory_space<vmem>>, vector<8x16xf32>,
    %c0_54 = arith.constant 0 : index
    %c48 = arith.constant 48 : index
    %59 = vector.load %arg10[%c0_54, %c48] : memref<16x64xf32, #tpu.memory_space<vmem>>, vector<8x16xf32>
    %c0_55 = arith.constant 0 : index
    %c48_56 = arith.constant 48 : index
    %60 = vector.load %arg11[%c0_55, %c48_56] : memref<16x64xf32, #tpu.memory_space<vmem>>, vector<8x16xf32>
    %c0_57 = arith.constant 0 : index
    %c48_58 = arith.constant 48 : index
    %61 = vector.load %arg12[%c0_57, %c48_58] : memref<16x64xf32, #tpu.memory_space<vmem>>, vector<8x16xf32>
    %cst_59 = arith.constant dense<0.000000e+00> : vector<8x8xf32>
    %62 = tpu.matmul %59, %60, %cst_59 {dimension_numbers = #tpu.dot_dimension_numbers<[1], [1], [0], [0], [0, 0, 1, 0], [], []>} : vector<8x16xf32>, vector<8x16xf32>, vector<8x8xf32> -> vector<8x8xf32>
    %cst_60 = arith.constant dense<0xFF800000> : vector<8xf32>
    %63 = vector.multi_reduction <maximumf>, %62, %cst_60 [1] : vector<8x8xf32> to vector<8xf32>
    %64 = vector.shape_cast %63 : vector<8xf32> to vector<8x1xf32>
    %65 = vector.broadcast %64 : vector<8x1xf32> to vector<8x8xf32>
    %66 = arith.subf %62, %65 : vector<8x8xf32>
    %67 = math.exp %66 : vector<8x8xf32>
    %cst_61 = arith.constant dense<0.000000e+00> : vector<8xf32>
    %68 = vector.multi_reduction <add>, %67, %cst_61 [1] : vector<8x8xf32> to vector<8xf32>
    %69 = vector.shape_cast %68 : vector<8xf32> to vector<8x1xf32>
    %70 = vector.broadcast %69 : vector<8x1xf32> to vector<8x8xf32>
    %71 = arith.divf %67, %70 : vector<8x8xf32>
    %cst_62 = arith.constant dense<0.000000e+00> : vector<8x16xf32>
    %72 = tpu.matmul %71, %61, %cst_62 {dimension_numbers = #tpu.dot_dimension_numbers<[1], [0], [0], [1], [0, 0, 1, 1], [], []>} : vector<8x8xf32>, vector<8x16xf32>, vector<8x16xf32> -> vector<8x16xf32>
    %c0_63 = arith.constant 0 : index
    %c48_64 = arith.constant 48 : index
    %73 = vector.load %arg13[%c0_63, %c48_64] : memref<16x64xf32, #tpu.memory_space<vmem>>, vector<8x16xf32>
    tpu.vector_store %arg13[%c0_63, %c48_64], %72 {strides = array<i32>} : memref<16x64xf32, #tpu.memory_space<vmem>>, vector<8x16xf32>,
    %c8 = arith.constant 8 : index
    %c0_65 = arith.constant 0 : index
    %74 = vector.load %arg10[%c8, %c0_65] : memref<16x64xf32, #tpu.memory_space<vmem>>, vector<8x16xf32>
    %c8_66 = arith.constant 8 : index
    %c0_67 = arith.constant 0 : index
    %75 = vector.load %arg11[%c8_66, %c0_67] : memref<16x64xf32, #tpu.memory_space<vmem>>, vector<8x16xf32>
    %c8_68 = arith.constant 8 : index
    %c0_69 = arith.constant 0 : index
    %76 = vector.load %arg12[%c8_68, %c0_69] : memref<16x64xf32, #tpu.memory_space<vmem>>, vector<8x16xf32>
    %cst_70 = arith.constant dense<0.000000e+00> : vector<8x8xf32>
    %77 = tpu.matmul %74, %75, %cst_70 {dimension_numbers = #tpu.dot_dimension_numbers<[1], [1], [0], [0], [0, 0, 1, 0], [], []>} : vector<8x16xf32>, vector<8x16xf32>, vector<8x8xf32> -> vector<8x8xf32>
    %cst_71 = arith.constant dense<0xFF800000> : vector<8xf32>
    %78 = vector.multi_reduction <maximumf>, %77, %cst_71 [1] : vector<8x8xf32> to vector<8xf32>
    %79 = vector.shape_cast %78 : vector<8xf32> to vector<8x1xf32>
    %80 = vector.broadcast %79 : vector<8x1xf32> to vector<8x8xf32>
    %81 = arith.subf %77, %80 : vector<8x8xf32>
    %82 = math.exp %81 : vector<8x8xf32>
    %cst_72 = arith.constant dense<0.000000e+00> : vector<8xf32>
    %83 = vector.multi_reduction <add>, %82, %cst_72 [1] : vector<8x8xf32> to vector<8xf32>
    %84 = vector.shape_cast %83 : vector<8xf32> to vector<8x1xf32>
    %85 = vector.broadcast %84 : vector<8x1xf32> to vector<8x8xf32>
    %86 = arith.divf %82, %85 : vector<8x8xf32>
    %cst_73 = arith.constant dense<0.000000e+00> : vector<8x16xf32>
    %87 = tpu.matmul %86, %76, %cst_73 {dimension_numbers = #tpu.dot_dimension_numbers<[1], [0], [0], [1], [0, 0, 1, 1], [], []>} : vector<8x8xf32>, vector<8x16xf32>, vector<8x16xf32> -> vector<8x16xf32>
    %c8_74 = arith.constant 8 : index
    %c0_75 = arith.constant 0 : index
    %88 = vector.load %arg13[%c8_74, %c0_75] : memref<16x64xf32, #tpu.memory_space<vmem>>, vector<8x16xf32>
    tpu.vector_store %arg13[%c8_74, %c0_75], %87 {strides = array<i32>} : memref<16x64xf32, #tpu.memory_space<vmem>>, vector<8x16xf32>,
    %c8_76 = arith.constant 8 : index
    %c16_77 = arith.constant 16 : index
    %89 = vector.load %arg10[%c8_76, %c16_77] : memref<16x64xf32, #tpu.memory_space<vmem>>, vector<8x16xf32>
    %c8_78 = arith.constant 8 : index
    %c16_79 = arith.constant 16 : index
    %90 = vector.load %arg11[%c8_78, %c16_79] : memref<16x64xf32, #tpu.memory_space<vmem>>, vector<8x16xf32>
    %c8_80 = arith.constant 8 : index
    %c16_81 = arith.constant 16 : index
    %91 = vector.load %arg12[%c8_80, %c16_81] : memref<16x64xf32, #tpu.memory_space<vmem>>, vector<8x16xf32>
    %cst_82 = arith.constant dense<0.000000e+00> : vector<8x8xf32>
    %92 = tpu.matmul %89, %90, %cst_82 {dimension_numbers = #tpu.dot_dimension_numbers<[1], [1], [0], [0], [0, 0, 1, 0], [], []>} : vector<8x16xf32>, vector<8x16xf32>, vector<8x8xf32> -> vector<8x8xf32>
    %cst_83 = arith.constant dense<0xFF800000> : vector<8xf32>
    %93 = vector.multi_reduction <maximumf>, %92, %cst_83 [1] : vector<8x8xf32> to vector<8xf32>
    %94 = vector.shape_cast %93 : vector<8xf32> to vector<8x1xf32>
    %95 = vector.broadcast %94 : vector<8x1xf32> to vector<8x8xf32>
    %96 = arith.subf %92, %95 : vector<8x8xf32>
    %97 = math.exp %96 : vector<8x8xf32>
    %cst_84 = arith.constant dense<0.000000e+00> : vector<8xf32>
    %98 = vector.multi_reduction <add>, %97, %cst_84 [1] : vector<8x8xf32> to vector<8xf32>
    %99 = vector.shape_cast %98 : vector<8xf32> to vector<8x1xf32>
    %100 = vector.broadcast %99 : vector<8x1xf32> to vector<8x8xf32>
    %101 = arith.divf %97, %100 : vector<8x8xf32>
    %cst_85 = arith.constant dense<0.000000e+00> : vector<8x16xf32>
    %102 = tpu.matmul %101, %91, %cst_85 {dimension_numbers = #tpu.dot_dimension_numbers<[1], [0], [0], [1], [0, 0, 1, 1], [], []>} : vector<8x8xf32>, vector<8x16xf32>, vector<8x16xf32> -> vector<8x16xf32>
    %c8_86 = arith.constant 8 : index
    %c16_87 = arith.constant 16 : index
    %103 = vector.load %arg13[%c8_86, %c16_87] : memref<16x64xf32, #tpu.memory_space<vmem>>, vector<8x16xf32>
    tpu.vector_store %arg13[%c8_86, %c16_87], %102 {strides = array<i32>} : memref<16x64xf32, #tpu.memory_space<vmem>>, vector<8x16xf32>,
    %c8_88 = arith.constant 8 : index
    %c32_89 = arith.constant 32 : index
    %104 = vector.load %arg10[%c8_88, %c32_89] : memref<16x64xf32, #tpu.memory_space<vmem>>, vector<8x16xf32>
    %c8_90 = arith.constant 8 : index
    %c32_91 = arith.constant 32 : index
    %105 = vector.load %arg11[%c8_90, %c32_91] : memref<16x64xf32, #tpu.memory_space<vmem>>, vector<8x16xf32>
    %c8_92 = arith.constant 8 : index
    %c32_93 = arith.constant 32 : index
    %106 = vector.load %arg12[%c8_92, %c32_93] : memref<16x64xf32, #tpu.memory_space<vmem>>, vector<8x16xf32>
    %cst_94 = arith.constant dense<0.000000e+00> : vector<8x8xf32>
    %107 = tpu.matmul %104, %105, %cst_94 {dimension_numbers = #tpu.dot_dimension_numbers<[1], [1], [0], [0], [0, 0, 1, 0], [], []>} : vector<8x16xf32>, vector<8x16xf32>, vector<8x8xf32> -> vector<8x8xf32>
    %cst_95 = arith.constant dense<0xFF800000> : vector<8xf32>
    %108 = vector.multi_reduction <maximumf>, %107, %cst_95 [1] : vector<8x8xf32> to vector<8xf32>
    %109 = vector.shape_cast %108 : vector<8xf32> to vector<8x1xf32>
    %110 = vector.broadcast %109 : vector<8x1xf32> to vector<8x8xf32>
    %111 = arith.subf %107, %110 : vector<8x8xf32>
    %112 = math.exp %111 : vector<8x8xf32>
    %cst_96 = arith.constant dense<0.000000e+00> : vector<8xf32>
    %113 = vector.multi_reduction <add>, %112, %cst_96 [1] : vector<8x8xf32> to vector<8xf32>
    %114 = vector.shape_cast %113 : vector<8xf32> to vector<8x1xf32>
    %115 = vector.broadcast %114 : vector<8x1xf32> to vector<8x8xf32>
    %116 = arith.divf %112, %115 : vector<8x8xf32>
    %cst_97 = arith.constant dense<0.000000e+00> : vector<8x16xf32>
    %117 = tpu.matmul %116, %106, %cst_97 {dimension_numbers = #tpu.dot_dimension_numbers<[1], [0], [0], [1], [0, 0, 1, 1], [], []>} : vector<8x8xf32>, vector<8x16xf32>, vector<8x16xf32> -> vector<8x16xf32>
    %c8_98 = arith.constant 8 : index
    %c32_99 = arith.constant 32 : index
    %118 = vector.load %arg13[%c8_98, %c32_99] : memref<16x64xf32, #tpu.memory_space<vmem>>, vector<8x16xf32>
    tpu.vector_store %arg13[%c8_98, %c32_99], %117 {strides = array<i32>} : memref<16x64xf32, #tpu.memory_space<vmem>>, vector<8x16xf32>,
    %c8_100 = arith.constant 8 : index
    %c48_101 = arith.constant 48 : index
    %119 = vector.load %arg10[%c8_100, %c48_101] : memref<16x64xf32, #tpu.memory_space<vmem>>, vector<8x16xf32>
    %c8_102 = arith.constant 8 : index
    %c48_103 = arith.constant 48 : index
    %120 = vector.load %arg11[%c8_102, %c48_103] : memref<16x64xf32, #tpu.memory_space<vmem>>, vector<8x16xf32>
    %c8_104 = arith.constant 8 : index
    %c48_105 = arith.constant 48 : index
    %121 = vector.load %arg12[%c8_104, %c48_105] : memref<16x64xf32, #tpu.memory_space<vmem>>, vector<8x16xf32>
    %cst_106 = arith.constant dense<0.000000e+00> : vector<8x8xf32>
    %122 = tpu.matmul %119, %120, %cst_106 {dimension_numbers = #tpu.dot_dimension_numbers<[1], [1], [0], [0], [0, 0, 1, 0], [], []>} : vector<8x16xf32>, vector<8x16xf32>, vector<8x8xf32> -> vector<8x8xf32>
    %cst_107 = arith.constant dense<0xFF800000> : vector<8xf32>
    %123 = vector.multi_reduction <maximumf>, %122, %cst_107 [1] : vector<8x8xf32> to vector<8xf32>
    %124 = vector.shape_cast %123 : vector<8xf32> to vector<8x1xf32>
    %125 = vector.broadcast %124 : vector<8x1xf32> to vector<8x8xf32>
    %126 = arith.subf %122, %125 : vector<8x8xf32>
    %127 = math.exp %126 : vector<8x8xf32>
    %cst_108 = arith.constant dense<0.000000e+00> : vector<8xf32>
    %128 = vector.multi_reduction <add>, %127, %cst_108 [1] : vector<8x8xf32> to vector<8xf32>
    %129 = vector.shape_cast %128 : vector<8xf32> to vector<8x1xf32>
    %130 = vector.broadcast %129 : vector<8x1xf32> to vector<8x8xf32>
    %131 = arith.divf %127, %130 : vector<8x8xf32>
    %cst_109 = arith.constant dense<0.000000e+00> : vector<8x16xf32>
    %132 = tpu.matmul %131, %121, %cst_109 {dimension_numbers = #tpu.dot_dimension_numbers<[1], [0], [0], [1], [0, 0, 1, 1], [], []>} : vector<8x8xf32>, vector<8x16xf32>, vector<8x16xf32> -> vector<8x16xf32>
    %c8_110 = arith.constant 8 : index
    %c48_111 = arith.constant 48 : index
    %133 = vector.load %arg13[%c8_110, %c48_111] : memref<16x64xf32, #tpu.memory_space<vmem>>, vector<8x16xf32>
    tpu.vector_store %arg13[%c8_110, %c48_111], %132 {strides = array<i32>} : memref<16x64xf32, #tpu.memory_space<vmem>>, vector<8x16xf32>,
    %c0_112 = arith.constant 0 : index
    %c0_113 = arith.constant 0 : index
    %134 = vector.load %arg13[%c0_112, %c0_113] : memref<16x64xf32, #tpu.memory_space<vmem>>, vector<16x64xf32>
    %c0_114 = arith.constant 0 : index
    %c0_115 = arith.constant 0 : index
    %135 = vector.load %arg7[%c0_114, %c0_115] : memref<64x64xf32, #tpu.memory_space<vmem>>, vector<64x64xf32>
    %cst_116 = arith.constant dense<0.000000e+00> : vector<16x64xf32>
    %136 = tpu.matmul %134, %135, %cst_116 {dimension_numbers = #tpu.dot_dimension_numbers<[1], [0], [0], [1], [0, 0, 1, 1], [], []>} : vector<16x64xf32>, vector<64x64xf32>, vector<16x64xf32> -> vector<16x64xf32>
    %c0_117 = arith.constant 0 : index
    %c0_118 = arith.constant 0 : index
    %137 = vector.load %arg8[%c0_117, %c0_118] : memref<1x64xf32, #tpu.memory_space<vmem>>, vector<1x64xf32>
    %138 = vector.broadcast %137 : vector<1x64xf32> to vector<16x64xf32>
    %139 = arith.addf %136, %138 : vector<16x64xf32>
    %c0_119 = arith.constant 0 : index
    %c0_120 = arith.constant 0 : index
    %140 = vector.load %arg9[%c0_119, %c0_120] : memref<16x64xf32, #tpu.memory_space<vmem>>, vector<16x64xf32>
    tpu.vector_store %arg9[%c0_119, %c0_120], %139 {strides = array<i32>} : memref<16x64xf32, #tpu.memory_space<vmem>>, vector<16x64xf32>,
    return
  }
  func.func @transform_0(%arg0: i32) -> (i32, i32) {
    %c0_i32 = arith.constant 0 : i32
    %c0_i32_0 = arith.constant 0 : i32
    %c0_i32_1 = arith.constant 0 : i32
    return %c0_i32, %c0_i32_0 : i32, i32
  }
  func.func @transform_1(%arg0: i32) -> (i32, i32) {
    %c0_i32 = arith.constant 0 : i32
    %c0_i32_0 = arith.constant 0 : i32
    %c0_i32_1 = arith.constant 0 : i32
    return %c0_i32, %c0_i32_0 : i32, i32
  }
  func.func @transform_2(%arg0: i32) -> (i32, i32) {
    %c0_i32 = arith.constant 0 : i32
    %c0_i32_0 = arith.constant 0 : i32
    %c0_i32_1 = arith.constant 0 : i32
    return %c0_i32, %c0_i32_0 : i32, i32
  }
  func.func @transform_3(%arg0: i32) -> (i32, i32) {
    %c0_i32 = arith.constant 0 : i32
    %c0_i32_0 = arith.constant 0 : i32
    %c0_i32_1 = arith.constant 0 : i32
    return %c0_i32, %c0_i32_0 : i32, i32
  }
  func.func @transform_4(%arg0: i32) -> (i32, i32) {
    %c0_i32 = arith.constant 0 : i32
    %c0_i32_0 = arith.constant 0 : i32
    %c0_i32_1 = arith.constant 0 : i32
    return %c0_i32, %c0_i32_0 : i32, i32
  }
  func.func @transform_5(%arg0: i32) -> (i32, i32) {
    %c0_i32 = arith.constant 0 : i32
    %c0_i32_0 = arith.constant 0 : i32
    %c0_i32_1 = arith.constant 0 : i32
    return %c0_i32, %c0_i32_0 : i32, i32
  }
  func.func @transform_6(%arg0: i32) -> (i32, i32) {
    %c0_i32 = arith.constant 0 : i32
    %c0_i32_0 = arith.constant 0 : i32
    %c0_i32_1 = arith.constant 0 : i32
    return %c0_i32, %c0_i32_0 : i32, i32
  }
  func.func @transform_7(%arg0: i32) -> (i32, i32) {
    %c0_i32 = arith.constant 0 : i32
    %c0_i32_0 = arith.constant 0 : i32
    %c0_i32_1 = arith.constant 0 : i32
    return %c0_i32, %c0_i32_0 : i32, i32
  }
  func.func @transform_8(%arg0: i32) -> (i32, i32) {
    %c0_i32 = arith.constant 0 : i32
    %c0_i32_0 = arith.constant 0 : i32
    %c0_i32_1 = arith.constant 0 : i32
    return %c0_i32, %c0_i32_0 : i32, i32
  }
}

</mosaic_0001>

<bundles_post_ra>
// kernel: tpu_custom_call.1
= control target key start
LH: loop header
LB: loop body
LE: loop exit
PB: predicated region body
PF: predicated region fallthrough
CT: control target
= control target key end

     0   :  { %13 = vsyncpa [#allocation7], 0  ;;  %s2859_s0 = inlined_call_operand.hbm [shape: f32[16,64], index: 0, kind: input, shape index: {}]   ;;  %s2860_s1 = inlined_call_operand.hbm [shape: f32[16,64], index: 1, kind: input, shape index: {}]   ;;  %s2861_s2 = inlined_call_operand.hbm [shape: f32[16,64], index: 2, kind: input, shape index: {}]   ;;  %s2862_s3 = inlined_call_operand.hbm [shape: f32[64,64], index: 3, kind: input, shape index: {}]   ;;  %s2863_s4 = inlined_call_operand.hbm [shape: f32[64,64], index: 4, kind: input, shape index: {}]   ;;  %s2864_s5 = inlined_call_operand.hbm [shape: f32[64,64], index: 5, kind: input, shape index: {}]   ;;  %s2865_s6 = inlined_call_operand.hbm [shape: f32[64,64], index: 6, kind: input, shape index: {}]   ;;  %s2866_s7 = inlined_call_operand.vmem [shape: f32[1,64], index: 7, kind: input, shape index: {}]   ;;  %s2867_s8 = inlined_call_operand.hbm [shape: f32[16,64], index: 8, kind: output, shape index: {}]  }
   0x1   :  { %14 = vsyncpa [#allocation10], 0 }
   0x2   :  { %15 = vsyncpa [#allocation13], 0 }
   0x3   :  { %16 = vsyncpa [#allocation16], 0 }
   0x4   :  { %17 = vsyncpa [#allocation8], 0  ;;  %s2477_s27 = smov [#allocation9]   ;;  %s2478_s29 = smov [#allocation12]  }
   0x5   :  { %s35_s28 = sshll.u32 %s2477_s27, 4  ;;  %s59_s30 = sshll.u32 %s2478_s29, 4  ;;  %s36_s28 = int_to_ptr.vmem [resolvable:$true] %s35_s28  ;;  %s2540_s30 = int_to_ptr.vmem [resolvable:$true] %s59_s30 }
   0x6   :  { %s2291_s11 = scalar_lea.hbm %s2860_s1, 256 }
   0x7   :  { %p2292_p0 = scmp.ne.s32.totalorder %s2860_s1, %s2291_s11  ;;  %p2295_p1 = scmp.lt.u32.totalorder %s2291_s11, %s2860_s1 }
   0x9   :  { %p2297_p2 = pnand %p2295_p1, %p2292_p0 }
   0xb   :  { %2300 = shalt.err (!%p2297_p2)
}
   0xc   :  { %s2301_s16 = scalar_lea.vmem %s36_s28, 256  ;;  %p2306_p4 = scmp.lt.s32.totalorder %s36_s28, %s36_s28 }
   0xd   :  { %p2302_p3 = scmp.ne.s32.totalorder %s36_s28, %s2301_s16  ;;  %p2307_p5 = scmp.lt.s32.totalorder %s2301_s16, %s2301_s16 }
   0xf   :  { %p2308_p6 = por %p2307_p5, %p2306_p4 }
  0x11   :  { %p2309_p7 = pnand %p2308_p6, %p2302_p3 }
  0x13   :  { %2312 = shalt.err (!%p2309_p7)
}
  0x14   :  { %s2479_s17 = smov 128   ;;  %s2480_s18 = smov 8  }
  0x15   :  { %41 = dma.hbm_to_vmem [thread:$0]  %s2860_s1, 256, %s36_s28, [#allocation10], %s2479_s17, %s2479_s17, %s2480_s18  }
  0x16   :  { %s2313_s23 = scalar_lea.hbm %s2862_s3, 1024 }
  0x17   :  { %p2314_p8 = scmp.ne.s32.totalorder %s2862_s3, %s2313_s23  ;;  %p2317_p9 = scmp.lt.u32.totalorder %s2313_s23, %s2862_s3 }
  0x19   :  { %p2319_p10 = pnand %p2317_p9, %p2314_p8 }
  0x1b   :  { %2322 = shalt.err (!%p2319_p10)
}
  0x1c   :  { %s2323_s29 = scalar_lea.vmem %s2540_s30, 1024  ;;  %p2328_p12 = scmp.lt.s32.totalorder %s2540_s30, %s2540_s30 }
  0x1d   :  { %p2324_p11 = scmp.ne.s32.totalorder %s2540_s30, %s2323_s29  ;;  %p2329_p13 = scmp.lt.s32.totalorder %s2323_s29, %s2323_s29 }
  0x1f   :  { %p2330_p0 = por %p2329_p13, %p2328_p12 }
  0x21   :  { %p2331_p1 = pnand %p2330_p0, %p2324_p11 }
  0x23   :  { %2334 = shalt.err (!%p2331_p1)
}
  0x24   :  { %65 = dma.hbm_to_vmem [thread:$0]  %s2862_s3, 1024, %s2540_s30, [#allocation13], %s2479_s17, %s2479_s17, %s2480_s18  }
  0x25   :  { %s2481_s9 = smov [#allocation15]   ;;  %s2482_s11 = smov [#allocation6]  }
  0x26   :  { %s83_s10 = sshll.u32 %s2481_s9, 4  ;;  %s23_s12 = sshll.u32 %s2482_s11, 4  ;;  %s84_s10 = int_to_ptr.vmem [resolvable:$true] %s83_s10  ;;  %s2577_s12 = int_to_ptr.vmem [resolvable:$true] %s23_s12 }
  0x27   :  { %s2335_s15 = scalar_lea.hbm %s2864_s5, 1024 }
  0x28   :  { %p2336_p2 = scmp.ne.s32.totalorder %s2864_s5, %s2335_s15  ;;  %p2339_p3 = scmp.lt.u32.totalorder %s2335_s15, %s2864_s5 }
  0x2a   :  { %p2341_p4 = pnand %p2339_p3, %p2336_p2 }
  0x2c   :  { %2344 = shalt.err (!%p2341_p4)
}
  0x2d   :  { %s2345_s3 = scalar_lea.vmem %s84_s10, 1024  ;;  %p2350_p6 = scmp.lt.s32.totalorder %s84_s10, %s84_s10 }
  0x2e   :  { %p2346_p5 = scmp.ne.s32.totalorder %s84_s10, %s2345_s3  ;;  %p2351_p7 = scmp.lt.s32.totalorder %s2345_s3, %s2345_s3 }
  0x30   :  { %p2352_p8 = por %p2351_p7, %p2350_p6 }
  0x32   :  { %p2353_p9 = pnand %p2352_p8, %p2346_p5 }
  0x34   :  { %2356 = shalt.err (!%p2353_p9)
}
  0x35   :  { %89 = dma.hbm_to_vmem [thread:$0]  %s2864_s5, 1024, %s84_s10, [#allocation16], %s2479_s17, %s2479_s17, %s2480_s18  }
  0x36   :  { %s2357_s25 = scalar_lea.hbm %s2859_s0, 256 }
  0x37   :  { %p2358_p10 = scmp.ne.s32.totalorder %s2859_s0, %s2357_s25  ;;  %p2361_p11 = scmp.lt.u32.totalorder %s2357_s25, %s2859_s0 }
  0x39   :  { %p2363_p12 = pnand %p2361_p11, %p2358_p10 }
  0x3b   :  { %2366 = shalt.err (!%p2363_p12)
}
  0x3c   :  { %s2367_s28 = scalar_lea.vmem %s2577_s12, 256  ;;  %p2372_p0 = scmp.lt.s32.totalorder %s2577_s12, %s2577_s12 }
  0x3d   :  { %p2368_p13 = scmp.ne.s32.totalorder %s2577_s12, %s2367_s28  ;;  %p2373_p1 = scmp.lt.s32.totalorder %s2367_s28, %s2367_s28 }
  0x3f   :  { %p2374_p2 = por %p2373_p1, %p2372_p0 }
  0x41   :  { %p2375_p3 = pnand %p2374_p2, %p2368_p13 }
  0x43   :  { %2378 = shalt.err (!%p2375_p3)
}
  0x44   :  { %29 = dma.hbm_to_vmem [thread:$0]  %s2859_s0, 256, %s2577_s12, [#allocation7], %s2479_s17, %s2479_s17, %s2480_s18  }
  0x45   :  { %s2483_s10 = smov [#allocation11]   ;;  %s2484_s13 = smov [#allocation14]  }
  0x46   :  { %s47_s11 = sshll.u32 %s2483_s10, 4  ;;  %s71_s14 = sshll.u32 %s2484_s13, 4  ;;  %s48_s11 = int_to_ptr.vmem [resolvable:$true] %s47_s11  ;;  %s2614_s14 = int_to_ptr.vmem [resolvable:$true] %s71_s14 }
  0x47   :  { %s2379_s19 = scalar_lea.hbm %s2861_s2, 256 }
  0x48   :  { %p2380_p4 = scmp.ne.s32.totalorder %s2861_s2, %s2379_s19  ;;  %p2383_p5 = scmp.lt.u32.totalorder %s2379_s19, %s2861_s2 }
  0x4a   :  { %p2385_p6 = pnand %p2383_p5, %p2380_p4 }
  0x4c   :  { %2388 = shalt.err (!%p2385_p6)
}
  0x4d   :  { %s2389_s0 = scalar_lea.vmem %s48_s11, 256  ;;  %p2394_p8 = scmp.lt.s32.totalorder %s48_s11, %s48_s11 }
  0x4e   :  { %p2390_p7 = scmp.ne.s32.totalorder %s48_s11, %s2389_s0  ;;  %p2395_p9 = scmp.lt.s32.totalorder %s2389_s0, %s2389_s0 }
  0x50   :  { %p2396_p10 = por %p2395_p9, %p2394_p8 }
  0x52   :  { %p2397_p11 = pnand %p2396_p10, %p2390_p7 }
  0x54   :  { %2400 = shalt.err (!%p2397_p11)
}
  0x55   :  { %53 = dma.hbm_to_vmem [thread:$0]  %s2861_s2, 256, %s48_s11, [#allocation10], %s2479_s17, %s2479_s17, %s2480_s18  }
  0x56   :  { %s2401_s25 = scalar_lea.hbm %s2863_s4, 1024 }
  0x57   :  { %p2402_p12 = scmp.ne.s32.totalorder %s2863_s4, %s2401_s25  ;;  %p2405_p13 = scmp.lt.u32.totalorder %s2401_s25, %s2863_s4 }
  0x59   :  { %p2407_p0 = pnand %p2405_p13, %p2402_p12 }
  0x5b   :  { %2410 = shalt.err (!%p2407_p0)
}
  0x5c   :  { %s2411_s28 = scalar_lea.vmem %s2614_s14, 1024  ;;  %p2416_p2 = scmp.lt.s32.totalorder %s2614_s14, %s2614_s14 }
  0x5d   :  { %p2412_p1 = scmp.ne.s32.totalorder %s2614_s14, %s2411_s28  ;;  %p2417_p3 = scmp.lt.s32.totalorder %s2411_s28, %s2411_s28 }
  0x5f   :  { %p2418_p4 = por %p2417_p3, %p2416_p2 }
  0x61   :  { %p2419_p5 = pnand %p2418_p4, %p2412_p1 }
  0x63   :  { %2422 = shalt.err (!%p2419_p5)
}
  0x64   :  { %77 = dma.hbm_to_vmem [thread:$0]  %s2863_s4, 1024, %s2614_s14, [#allocation13], %s2479_s17, %s2479_s17, %s2480_s18  }
  0x65   :  { %s2485_s9 = smov [#allocation17]   ;;  %s2423_s15 = scalar_lea.hbm %s2865_s6, 1024 }
  0x66   :  { %s95_s10 = sshll.u32 %s2485_s9, 4  ;;  %p2424_p6 = scmp.ne.s32.totalorder %s2865_s6, %s2423_s15  ;;  %s96_s10 = int_to_ptr.vmem [resolvable:$true] %s95_s10 }
  0x67   :  { %p2427_p7 = scmp.lt.u32.totalorder %s2423_s15, %s2865_s6 }
  0x69   :  { %p2429_p8 = pnand %p2427_p7, %p2424_p6 }
  0x6b   :  { %2432 = shalt.err (!%p2429_p8)
}
  0x6c   :  { %s2433_s3 = scalar_lea.vmem %s96_s10, 1024  ;;  %p2438_p10 = scmp.lt.s32.totalorder %s96_s10, %s96_s10 }
  0x6d   :  { %p2434_p9 = scmp.ne.s32.totalorder %s96_s10, %s2433_s3  ;;  %p2439_p11 = scmp.lt.s32.totalorder %s2433_s3, %s2433_s3 }
  0x6f   :  { %p2440_p12 = por %p2439_p11, %p2438_p10 }
  0x71   :  { %p2441_p13 = pnand %p2440_p12, %p2434_p9 }
  0x73   :  { %2444 = shalt.err (!%p2441_p13)
}
  0x74   :  { %101 = dma.hbm_to_vmem [thread:$0]  %s2865_s6, 1024, %s96_s10, [#allocation16], %s2479_s17, %s2479_s17, %s2480_s18  }
  0x75   :  { %2467 = dma.done.wait [#allocation7], 256  }
  0x76   :  { %2468 = vsyncadd [#allocation7], 4294967040 }
  0x77   :  { %2469 = dma.done.wait [#allocation10], 512  }
  0x78   :  { %2470 = vsyncadd [#allocation10], 4294966784 }
  0x79   :  { %2471 = dma.done.wait [#allocation13], 2048  }
  0x7a   :  { %2472 = vsyncadd [#allocation13], 4294965248 }
  0x7b   :  { %2473 = dma.done.wait [#allocation16], 2048  }
  0x7c   :  { %2474 = vsyncadd [#allocation16], 4294965248  ;;  %v223_v0 = vld [vmem:[#allocation14] sm:$0xff]  ;;  %v224_v1 = vld [vmem:[#allocation14 + $0x8] sm:$0xff]  ;;  %vm135_vm0 = vcmask 523264   ;;  %v2486_v42 = vmov 0.0  }
  0x7d   :  { %v127_v2 = vld [vmem:[#allocation12] sm:$0xff]  ;;  %v2193_v3 = vpack.c.bf16 %v224_v1, %v223_v0  ;;  %v128_v4 = vld [vmem:[#allocation12 + $0x8] sm:$0xff]  ;;  %v225_v5 = vld [vmem:[#allocation14 + $0x10] sm:$0xff]  ;;  %vm2487_vm1 = vmmov 0   ;;  %vm410_vm2 = vcmask 130048   ;;  %s2488_s6 = smov 112  }
  0x7e   :  { %v226_v6 = vld [vmem:[#allocation14 + $0x18] sm:$0xff]  ;;  %v2177_v7 = vpack.c.bf16 %v128_v4, %v127_v2  ;;  %v129_v9 = vld [vmem:[#allocation12 + $0x10] sm:$0xff]  ;;  %v227_v11 = vld [vmem:[#allocation14 + $0x20] sm:$0xff]  ;;  %vm487_vm3 = vcmask 64512   ;;  %s2489_s30 = smov 96   ;;  %s2490_s0 = smov 80  }
  0x7f   :  { %v2197_v8 = vpack.c.bf16 %v226_v6, %v225_v5  ;;  %v130_v10 = vld [vmem:[#allocation12 + $0x18] sm:$0xff]  ;;  %2194 = vmatprep.subr.bf16.mxu1 %v2193_v3  ;;  %v228_v13 = vld [vmem:[#allocation14 + $0x28] sm:$0xff]  ;;  %v131_v14 = vld [vmem:[#allocation12 + $0x20] sm:$0xff]  ;;  %s2491_s12 = smov 16   ;;  %s2492_s22 = smov 32   ;;  %vm748_vm4 = vcmask 261248  }
  0x80   :  { %v2181_v12 = vpack.c.bf16 %v130_v10, %v129_v9  ;;  %v132_v15 = vld [vmem:[#allocation12 + $0x28] sm:$0xff]  ;;  %2178 = vmatprep.subr.bf16.mxu0 %v2177_v7  ;;  %2196 = vmatpush3.bf16.msra.mxu1 %v2193_v3  ;;  %v2201_v16 = vpack.c.bf16 %v228_v13, %v227_v11  ;;  %v221_v17 = vld [vmem:[#allocation6] sm:$0xff]  ;;  %v125_v18 = vld [vmem:[#allocation9] sm:$0xff]  ;;  %vm925_vm5 = vcmask 392448   ;;  %s2493_s23 = smov 48   ;;  %vm1102_vm6 = vcmask 523648  }
  0x81   :  { %2180 = vmatpush3.bf16.msra.mxu0 %v2177_v7  ;;  %2198 = vmatprep.subr.bf16.mxu1 %v2197_v8  ;;  %v2185_v19 = vpack.c.bf16 %v132_v15, %v131_v14  ;;  %v229_v20 = vld [vmem:[#allocation14 + $0x30] sm:$0xff]  ;;  %v230_v21 = vld [vmem:[#allocation14 + $0x38] sm:$0xff]  ;;  %v316_v26 = vld [vmem:[#allocation15] sm:$0xff]  ;;  %s2494_s26 = smov [#allocation18]  }
  0x82   :  { %2182 = vmatprep.subr.bf16.mxu0 %v2181_v12  ;;  %2056 = vmatprep.mubr.msk.f32.mxu1 %vm135_vm0, %v221_v17  ;;  %v133_v22 = vld [vmem:[#allocation12 + $0x30] sm:$0xff]  ;;  %v134_v23 = vld [vmem:[#allocation12 + $0x38] sm:$0xff]  ;;  %v2205_v24 = vpack.c.bf16 %v230_v21, %v229_v20  ;;  %v317_v27 = vld [vmem:[#allocation15 + $0x8] sm:$0xff]  ;;  %s1901_s27 = sshll.u32 %s2494_s26, 4  ;;  %s1902_s27 = int_to_ptr.vmem [resolvable:$true] %s1901_s27 }
  0x83   :  { %2037 = vmatprep.mubr.msk.f32.mxu0 %vm135_vm0, %v125_v18  ;;  %v2189_v25 = vpack.c.bf16 %v134_v23, %v133_v22  ;;  %v2209_v28 = vpack.c.bf16 %v317_v27, %v316_v26  ;;  %v318_v29 = vld [vmem:[#allocation15 + $0x10] sm:$0xff]  ;;  %v319_v30 = vld [vmem:[#allocation15 + $0x18] sm:$0xff]  ;;  %v126_v32 = vld [vmem:[#allocation9 + $0x8] sm:$0xff]  ;;  %s2445_s29 = scalar_lea.vmem %s1902_s27, 256  ;;  %p2450_p1 = scmp.lt.s32.totalorder %s1902_s27, %s1902_s27 }
  0x84   :  { %2200 = vmatpush3.bf16.msra.mxu1 %v2197_v8  ;;  %v222_v31 = vld [vmem:[#allocation6 + $0x8] sm:$0xff]  ;;  %v2213_v33 = vpack.c.bf16 %v319_v30, %v318_v29  ;;  %v320_v34 = vld [vmem:[#allocation15 + $0x20] sm:$0xff]  ;;  %v321_v35 = vld [vmem:[#allocation15 + $0x28] sm:$0xff]  ;;  %p2446_p0 = scmp.ne.s32.totalorder %s1902_s27, %s2445_s29  ;;  %p2451_p2 = scmp.lt.s32.totalorder %s2445_s29, %s2445_s29 }
  0x85   :  { %2184 = vmatpush3.bf16.msra.mxu0 %v2181_v12  ;;  %2202 = vmatprep.subr.bf16.mxu1 %v2201_v16  ;;  %v2217_v36 = vpack.c.bf16 %v321_v35, %v320_v34  ;;  %v322_v37 = vld [vmem:[#allocation15 + $0x30] sm:$0xff]  ;;  %v323_v38 = vld [vmem:[#allocation15 + $0x38] sm:$0xff] }
  0x86   :  { %2186 = vmatprep.subr.bf16.mxu0 %v2185_v19  ;;  %v2221_v39 = vpack.c.bf16 %v323_v38, %v322_v37  ;;  %v314_v40 = vld [vmem:[#allocation11] sm:$0xff]  ;;  %v315_v41 = vld [vmem:[#allocation11 + $0x8] sm:$0xff]  ;;  %p2452_p3 = por %p2451_p2, %p2450_p1 }
  0x88   :  { %2204 = vmatpush3.bf16.msra.mxu1 %v2201_v16  ;;  %p2453_p4 = pnand %p2452_p3, %p2446_p0 }
  0x89   :  { %2188 = vmatpush3.bf16.msra.mxu0 %v2185_v19  ;;  %2206 = vmatprep.subr.bf16.mxu1 %v2205_v24 }
  0x8a   :  { %2190 = vmatprep.subr.bf16.mxu0 %v2189_v25 }
  0x8c   :  { %2208 = vmatpush3.bf16.msra.mxu1 %v2205_v24 }
  0x8d   :  { %2192 = vmatpush3.bf16.msra.mxu0 %v2189_v25  ;;  %2078 = vmatprep.subr.mxu1 %v2486_v42 }
  0x8e   :  { %2210 = vmatprep.subr.bf16.mxu0 %v2209_v28 }
  0x8f   :  { %2057 = vmatmul.mubr.msk.f32.vlgmr.msra.gmra.mrb[0].mxu1 %vm135_vm0, %v222_v31 }
  0x90   :  { %2038 = vmatmul.mubr.msk.f32.vlgmr.msra.gmra.mrb[0].mxu0 %vm135_vm0, %v126_v32  ;;  %2080 = vmatprep.mubr.msk.f32.mxu1 %vm2487_vm1, %v2486_v42 }
  0x91   :  { %2212 = vmatpush3.bf16.msra.mxu0 %v2209_v28  ;;  %2075 = vmatprep.mubr.msk.f32.mxu0 %vm135_vm0, %v314_v40 }
  0x92   :  { %2214 = vmatprep.subr.bf16.mxu0 %v2213_v33 }
  0x95   :  { %2216 = vmatpush3.bf16.msra.mxu0 %v2213_v33 }
  0x96   :  { %2218 = vmatprep.subr.bf16.mxu0 %v2217_v36 }
  0x99   :  { %2220 = vmatpush3.bf16.msra.mxu0 %v2217_v36 }
  0x9a   :  { %2222 = vmatprep.subr.bf16.mxu0 %v2221_v39 }
  0x9d   :  { %2224 = vmatpush3.bf16.msra.mxu0 %v2221_v39 }
  0x9e   :  { %2118 = vmatprep.subr.mxu0 %v2486_v42 }
  0xa0   :  { %2076 = vmatmul.mubr.msk.f32.vlgmr.msra.gmra.mrb[2].mxu0 %vm135_vm0, %v315_v41 }
  0xa1   :  { %2120 = vmatprep.mubr.msk.f32.mxu0 %vm2487_vm1, %v2486_v42 }
 0x162   :  { %v2058_v43 = vpop.f32.mrb[0].mxu1 }
 0x163   :  { %313 = vst.msk [vmem:[#allocation3 + $0x8] sm:$0xff] %vm135_vm0, %v2058_v43  ;;  %v2039_v44 = vpop.f32.mrb[0].mxu0  ;;  %v303_v45 = vpop.f32.mrb[1].mxu1 }
 0x164   :  { %v218_v46 = vmul.f32 0.25, %v2039_v44  ;;  %312 = vst.msk [vmem:[#allocation3] sm:$0xff] %vm135_vm0, %v303_v45  ;;  %v208_v47 = vpop.f32.mrb[1].mxu0 }
 0x165   :  { %v217_v48 = vmul.f32 0.25, %v208_v47 }
 0x166   :  { %220 = vst.msk [vmem:[#allocation2 + $0x8] sm:$0xff] %vm135_vm0, %v218_v46 }
 0x167   :  { %219 = vst.msk [vmem:[#allocation2] sm:$0xff] %vm135_vm0, %v217_v48 }
 0x16a   :  { %v2682_v49 = vld [vmem:[#allocation3 + $0x8] sm:$0xff] }
 0x16b   :  { %2119 = vmatpush3.xpose.msk.msra.mxu0 %vm410_vm2, %v2682_v49  ;;  %v2686_v50 = vld [vmem:[#allocation3] sm:$0xff] }
 0x16c   :  { %580 = vrot.lane.b32.xlu1 %v2686_v50, %s2488_s6  ;;  %2079 = vmatpush3.xpose.msk.msra.mxu1 %vm410_vm2, %v2686_v50 }
 0x16d   :  { %v2692_v51 = vld [vmem:[#allocation2 + $0x8] sm:$0xff]  ;;  %2083 = vmatprep.subr.mxu1 %v2486_v42  ;;  %2128 = vmatprep.subr.mxu0 %v2486_v42 }
 0x16e   :  { %2121 = vmatmul.mubr.msk.f32.vlgmr.msra.gmra.mrb[4].mxu0 %vm410_vm2, %v2692_v51  ;;  %v407_v52 = vld [vmem:[#allocation2] sm:$0xff] }
 0x16f   :  { %2081 = vmatmul.mubr.msk.f32.vlgmr.msra.gmra.mrb[2].mxu1 %vm410_vm2, %v407_v52  ;;  %2130 = vmatprep.mubr.msk.f32.mxu0 %vm2487_vm1, %v2486_v42 }
 0x170   :  { %577 = vrot.lane.b32.xlu1 %v407_v52, %s2488_s6  ;;  %2085 = vmatprep.mubr.msk.f32.mxu1 %vm2487_vm1, %v2486_v42 }
 0x173   :  { %v2077_v53 = vpop.f32.mrb[2].mxu0 }
 0x174   :  { %406 = vst.msk [vmem:[#allocation4 + $0x8] sm:$0xff] %vm135_vm0, %v2077_v53  ;;  %v396_v54 = vpop.f32.mrb[3].mxu0 }
 0x175   :  { %405 = vst.msk [vmem:[#allocation4] sm:$0xff] %vm135_vm0, %v396_v54 }
 0x17c   :  { %v2710_v1 = vld [vmem:[#allocation4] sm:$0xff] }
 0x17d   :  { %2084 = vmatpush3.msra.mxu1 %v2710_v1 }
 0x17e   :  { %2088 = vmatprep.subr.mxu1 %v2486_v42 }
 0x1de   :  { %v581_v4 = vpop.permute.xlu1 %580 }
 0x1e2   :  { %v578_v6 = vpop.permute.xlu1 %577 }
 0x241   :  { %v2706_v55 = vpop.f32.mrb[4].mxu0 }
 0x242   :  { %v483_v56 = vpop.f32.mrb[2].mxu1  ;;  %v2122_v57 = vpop.f32.mrb[5].mxu0  ;;  %v1183_v29 = vsel %vm487_vm3, %v2706_v55, -inf }
 0x243   :  { %v2082_v58 = vpop.f32.mrb[3].mxu1  ;;  %v488_v59 = vsel %vm487_vm3, %v483_v56, -inf }
 0x244   :  { %489 = vmax.xlane.f32.xlu0 %v488_v59 }
 0x2d1   :  { %v490_v60 = vpop.xlane.xlu0 %489 }
 0x2d2   :  { %v491_v61 = vsub.f32 %v483_v56, %v490_v60 }
 0x2d4   :  { %v492_v62 = vmul.f32 1.442695, %v491_v61 }
 0x2d6   :  { %2259 = vpow2.f32 %v492_v62 }
 0x2e0   :  { %v2260_v63 = vpop.eup %2259 }
 0x2e1   :  { %v494_v0 = vsel %vm487_vm3, %v2260_v63, 0.0 }
 0x2e2   :  { %495 = vadd.xlane.f32.xlu0 %v494_v0 }
 0x36f   :  { %v496_v2 = vpop.xlane.xlu0 %495 }
 0x370   :  { %2261 = vrcp.f32 %v496_v2 }
 0x37a   :  { %v2262_v3 = vpop.eup %2261 }
 0x37b   :  { %v498_v5 = vmul.f32 %v2262_v3, %v2260_v63 }
 0x37d   :  { %2086 = vmatmul.mubr.msk.f32.vlgmr.msra.gmra.mrb[4].mxu1 %vm487_vm3, %v498_v5 }
 0x37e   :  { %2089 = vmatpush3.xpose.msk.msra.mxu1 %vm410_vm2, %v581_v4  ;;  %2090 = vmatprep.mubr.msk.f32.mxu1 %vm2487_vm1, %v2486_v42 }
 0x37f   :  { %2093 = vmatprep.subr.mxu1 %v2486_v42 }
 0x381   :  { %2091 = vmatmul.mubr.msk.f32.vlgmr.msra.gmra.mrb[6].mxu1 %vm410_vm2, %v578_v6 }
 0x382   :  { %2095 = vmatprep.mubr.msk.f32.mxu1 %vm2487_vm1, %v2486_v42 }
 0x450   :  { %v568_v7 = vpop.f32.mrb[4].mxu1 }
 0x451   :  { %572 = vst.msk [vmem:[#allocation5] sm:$0xff] %vm410_vm2, %v568_v7  ;;  %v2087_v8 = vpop.f32.mrb[5].mxu1 }
 0x454   :  { %v652_v9 = vpop.f32.mrb[6].mxu1 }
 0x455   :  { %v2092_v10 = vpop.f32.mrb[7].mxu1  ;;  %v656_v11 = vsel %vm487_vm3, %v652_v9, -inf }
 0x456   :  { %657 = vmax.xlane.f32.xlu0 %v656_v11 }
 0x46c   :  { %668 = vrot.lane.b32.xlu0 %v2710_v1, %s2488_s6 }
 0x470   :  { %757 = vrot.lane.b32.xlu0 %v2686_v50, %s2489_s30 }
 0x474   :  { %754 = vrot.lane.b32.xlu0 %v407_v52, %s2489_s30 }
 0x4e3   :  { %v658_v12 = vpop.xlane.xlu0 %657 }
 0x4e4   :  { %v659_v13 = vsub.f32 %v652_v9, %v658_v12 }
 0x4e6   :  { %v660_v14 = vmul.f32 1.442695, %v659_v13 }
 0x4e7   :  { %v669_v15 = vpop.permute.xlu0 %668 }
 0x4e8   :  { %2263 = vpow2.f32 %v660_v14  ;;  %2094 = vmatpush3.msra.mxu1 %v669_v15 }
 0x4e9   :  { %2098 = vmatprep.subr.mxu1 %v2486_v42 }
 0x4eb   :  { %v758_v20 = vpop.permute.xlu0 %757 }
 0x4ef   :  { %v755_v22 = vpop.permute.xlu0 %754 }
 0x4f2   :  { %v2264_v16 = vpop.eup %2263 }
 0x4f3   :  { %v662_v17 = vsel %vm487_vm3, %v2264_v16, 0.0 }
 0x4f4   :  { %663 = vadd.xlane.f32.xlu1 %v662_v17 }
 0x505   :  { %845 = vrot.lane.b32.xlu1 %v2710_v1, %s2489_s30 }
 0x509   :  { %934 = vrot.lane.b32.xlu1 %v2686_v50, %s2490_s0 }
 0x50d   :  { %931 = vrot.lane.b32.xlu1 %v407_v52, %s2490_s0 }
 0x511   :  { %1272 = vrot.lane.b32.xlu1 %v2692_v51, %s2488_s6 }
 0x581   :  { %v664_v18 = vpop.xlane.xlu1 %663 }
 0x582   :  { %2265 = vrcp.f32 %v664_v18 }
 0x585   :  { %v846_v23 = vpop.permute.xlu1 %845 }
 0x589   :  { %v935_v30 = vpop.permute.xlu1 %934 }
 0x58c   :  { %v2266_v19 = vpop.eup %2265 }
 0x58d   :  { %v666_v21 = vmul.f32 %v2266_v19, %v2264_v16  ;;  %v932_v32 = vpop.permute.xlu1 %931 }
 0x58f   :  { %2096 = vmatmul.mubr.msk.f32.vlgmr.msra.gmra.mrb[8].mxu1 %vm487_vm3, %v666_v21 }
 0x590   :  { %2099 = vmatpush3.xpose.msk.msra.mxu1 %vm410_vm2, %v758_v20  ;;  %2100 = vmatprep.mubr.msk.f32.mxu1 %vm2487_vm1, %v2486_v42 }
 0x591   :  { %2103 = vmatprep.subr.mxu1 %v2486_v42  ;;  %v1273_v36 = vpop.permute.xlu1 %1272 }
 0x593   :  { %2101 = vmatmul.mubr.msk.f32.vlgmr.msra.gmra.mrb[10].mxu1 %vm410_vm2, %v755_v22 }
 0x594   :  { %2104 = vmatpush3.msra.mxu1 %v846_v23  ;;  %2105 = vmatprep.mubr.msk.f32.mxu1 %vm2487_vm1, %v2486_v42  ;;  %v1270_v23 = vld [vmem:[#allocation4 + $0x8] sm:$0xff] }
 0x595   :  { %2108 = vmatprep.subr.mxu1 %v2486_v42 }
 0x662   :  { %v2747_v24 = vpop.f32.mrb[8].mxu1 }
 0x663   :  { %v2097_v25 = vpop.f32.mrb[9].mxu1 }
 0x666   :  { %v829_v26 = vpop.f32.mrb[10].mxu1 }
 0x667   :  { %v2102_v27 = vpop.f32.mrb[11].mxu1  ;;  %v833_v28 = vsel %vm487_vm3, %v829_v26, -inf }
 0x668   :  { %834 = vmax.xlane.f32.xlu0 %v833_v28 }
 0x67e   :  { %1275 = vrot.lane.b32.xlu0 %v2682_v49, %s2488_s6 }
 0x69d   :  { %1184 = vmax.xlane.f32.xlu0 %v1183_v29 }
 0x6f5   :  { %v835_v31 = vpop.xlane.xlu0 %834 }
 0x6f6   :  { %v836_v33 = vsub.f32 %v829_v26, %v835_v31 }
 0x6f8   :  { %v837_v34 = vmul.f32 1.442695, %v836_v33 }
 0x6f9   :  { %v1276_v35 = vpop.permute.xlu0 %1275 }
 0x6fa   :  { %2267 = vpow2.f32 %v837_v34  ;;  %2129 = vmatpush3.xpose.msk.msra.mxu0 %vm410_vm2, %v1276_v35 }
 0x6fb   :  { %2138 = vmatprep.subr.mxu0 %v2486_v42 }
 0x6fd   :  { %2131 = vmatmul.mubr.msk.f32.vlgmr.msra.gmra.mrb[6].mxu0 %vm410_vm2, %v1273_v36 }
 0x6fe   :  { %2140 = vmatprep.mubr.msk.f32.mxu0 %vm2487_vm1, %v2486_v42 }
 0x704   :  { %v2268_v37 = vpop.eup %2267 }
 0x705   :  { %v839_v38 = vsel %vm487_vm3, %v2268_v37, 0.0 }
 0x706   :  { %840 = vadd.xlane.f32.xlu1 %v839_v38 }
 0x717   :  { %1451 = vrot.lane.b32.xlu1 %v2682_v49, %s2489_s30 }
 0x71b   :  { %1448 = vrot.lane.b32.xlu1 %v2692_v51, %s2489_s30 }
 0x71f   :  { %1627 = vrot.lane.b32.xlu1 %v2682_v49, %s2490_s0 }
 0x723   :  { %1624 = vrot.lane.b32.xlu1 %v2692_v51, %s2490_s0 }
 0x72a   :  { %v1185_v50 = vpop.xlane.xlu0 %1184 }
 0x72b   :  { %v1186_v51 = vsub.f32 %v2706_v55, %v1185_v50 }
 0x72d   :  { %v1187_v53 = vmul.f32 1.442695, %v1186_v51 }
 0x793   :  { %v841_v39 = vpop.xlane.xlu1 %840 }
 0x794   :  { %2269 = vrcp.f32 %v841_v39 }
 0x795   :  { %2271 = vpow2.f32 %v1187_v53  ;;  %v1802_v53 = vld [vmem:[#allocation17 + $0x20] sm:$0xff] }
 0x797   :  { %v1452_v40 = vpop.permute.xlu1 %1451 }
 0x798   :  { %2139 = vmatpush3.xpose.msk.msra.mxu0 %vm410_vm2, %v1452_v40 }
 0x799   :  { %2148 = vmatprep.subr.mxu0 %v2486_v42 }
 0x79b   :  { %v1449_v41 = vpop.permute.xlu1 %1448 }
 0x79c   :  { %2141 = vmatmul.mubr.msk.f32.vlgmr.msra.gmra.mrb[8].mxu0 %vm410_vm2, %v1449_v41 }
 0x79d   :  { %2150 = vmatprep.mubr.msk.f32.mxu0 %vm2487_vm1, %v2486_v42 }
 0x79e   :  { %v2270_v43 = vpop.eup %2269 }
 0x79f   :  { %v843_v44 = vmul.f32 %v2270_v43, %v2268_v37  ;;  %v1628_v45 = vpop.permute.xlu1 %1627  ;;  %v2786_v2 = vpop.eup %2271 }
 0x7a0   :  { %2149 = vmatpush3.xpose.msk.msra.mxu0 %vm410_vm2, %v1628_v45  ;;  %v1189_v4 = vsel %vm487_vm3, %v2786_v2, 0.0  ;;  %v1798_v45 = vld [vmem:[#allocation17] sm:$0xff] }
 0x7a1   :  { %2106 = vmatmul.mubr.msk.f32.vlgmr.msra.gmra.mrb[12].mxu1 %vm487_vm3, %v843_v44 }
 0x7a2   :  { %2109 = vmatpush3.xpose.msk.msra.mxu1 %vm410_vm2, %v935_v30  ;;  %2110 = vmatprep.mubr.msk.f32.mxu1 %vm2487_vm1, %v2486_v42 }
 0x7a3   :  { %v1625_v46 = vpop.permute.xlu1 %1624  ;;  %2113 = vmatprep.subr.mxu1 %v2486_v42 }
 0x7a4   :  { %2151 = vmatmul.mubr.msk.f32.vlgmr.msra.gmra.mrb[10].mxu0 %vm410_vm2, %v1625_v46  ;;  %v1799_v46 = vld [vmem:[#allocation17 + $0x8] sm:$0xff] }
 0x7a5   :  { %2111 = vmatmul.mubr.msk.f32.vlgmr.msra.gmra.mrb[14].mxu1 %vm410_vm2, %v932_v32 }
 0x7a6   :  { %2115 = vmatprep.mubr.msk.f32.mxu1 %vm2487_vm1, %v2486_v42 }
 0x7d0   :  { %v1347_v47 = vpop.f32.mrb[6].mxu0 }
 0x7d1   :  { %v2132_v48 = vpop.f32.mrb[7].mxu0  ;;  %v1351_v49 = vsel %vm487_vm3, %v1347_v47, -inf }
 0x7d2   :  { %1352 = vmax.xlane.f32.xlu0 %v1351_v49  ;;  %v1800_v48 = vld [vmem:[#allocation17 + $0x10] sm:$0xff]  ;;  %v1801_v49 = vld [vmem:[#allocation17 + $0x18] sm:$0xff] }
 0x7d3   :  { %v2229_v51 = vpack.c.bf16 %v1801_v49, %v1800_v48 }
 0x85f   :  { %v1353_v52 = vpop.xlane.xlu0 %1352 }
 0x860   :  { %v1354_v54 = vsub.f32 %v1347_v47, %v1353_v52  ;;  %v2225_v47 = vpack.c.bf16 %v1799_v46, %v1798_v45 }
 0x862   :  { %v1355_v57 = vmul.f32 1.442695, %v1354_v54  ;;  %2226 = vmatprep.subr.bf16.mxu0 %v2225_v47 }
 0x863   :  { %2228 = vmatpush3.bf16.msra.mxu0 %v2225_v47 }
 0x864   :  { %2273 = vpow2.f32 %v1355_v57  ;;  %2230 = vmatprep.subr.bf16.mxu0 %v2229_v51  ;;  %v1804_v57 = vld [vmem:[#allocation17 + $0x30] sm:$0xff] }
 0x867   :  { %2232 = vmatpush3.bf16.msra.mxu0 %v2229_v51 }
 0x86e   :  { %v2792_v6 = vpop.eup %2273 }
 0x86f   :  { %v1523_v56 = vpop.f32.mrb[8].mxu0  ;;  %v1357_v7 = vsel %vm487_vm3, %v2792_v6, 0.0 }
 0x870   :  { %v2142_v58 = vpop.f32.mrb[9].mxu0  ;;  %v1527_v5 = vsel %vm487_vm3, %v1523_v56, -inf }
 0x871   :  { %v1805_v58 = vld [vmem:[#allocation17 + $0x38] sm:$0xff] }
 0x874   :  { %v917_v59 = vpop.f32.mrb[12].mxu1 }
 0x875   :  { %v2107_v60 = vpop.f32.mrb[13].mxu1 }
 0x876   :  { %v2237_v60 = vpack.c.bf16 %v1805_v58, %v1804_v57 }
 0x877   :  { %v1699_v61 = vpop.f32.mrb[10].mxu0 }
 0x878   :  { %v1006_v62 = vpop.f32.mrb[14].mxu1  ;;  %v2152_v63 = vpop.f32.mrb[11].mxu0  ;;  %v1703_v0 = vsel %vm487_vm3, %v1699_v61, -inf }
 0x879   :  { %1704 = vmax.xlane.f32.xlu0 %v1703_v0  ;;  %v2112_v3 = vpop.f32.mrb[15].mxu1  ;;  %v1010_v55 = vsel %vm487_vm3, %v1006_v62, -inf }
 0x87a   :  { %1011 = vmax.xlane.f32.xlu1 %v1010_v55 }
 0x87d   :  { %1190 = vadd.xlane.f32.xlu0 %v1189_v4 }
 0x87e   :  { %1528 = vmax.xlane.f32.xlu1 %v1527_v5 }
 0x882   :  { %1358 = vadd.xlane.f32.xlu1 %v1357_v7 }
 0x906   :  { %v1705_v8 = vpop.xlane.xlu0 %1704 }
 0x907   :  { %v1706_v9 = vsub.f32 %v1699_v61, %v1705_v8  ;;  %v1012_v10 = vpop.xlane.xlu1 %1011 }
 0x908   :  { %v1013_v11 = vsub.f32 %v1006_v62, %v1012_v10 }
 0x909   :  { %v1707_v12 = vmul.f32 1.442695, %v1706_v9  ;;  %v1946_v9 = vld [vmem:[%s2866_s7] ss:$0 sm:$0xff] }
 0x90a   :  { %v1014_v13 = vmul.f32 1.442695, %v1013_v11  ;;  %v1191_v27 = vpop.xlane.xlu0 %1190 }
 0x90b   :  { %2275 = vpow2.f32 %v1707_v12  ;;  %v1529_v14 = vpop.xlane.xlu1 %1528 }
 0x90c   :  { %v1530_v15 = vsub.f32 %v1523_v56, %v1529_v14  ;;  %2277 = vpow2.f32 %v1014_v13 }
 0x90e   :  { %v1531_v16 = vmul.f32 1.442695, %v1530_v15 }
 0x90f   :  { %v1359_v25 = vpop.xlane.xlu1 %1358 }
 0x910   :  { %2279 = vpow2.f32 %v1531_v16 }
 0x915   :  { %v2796_v17 = vpop.eup %2275 }
 0x916   :  { %v1709_v18 = vsel %vm487_vm3, %v2796_v17, 0.0  ;;  %v2278_v19 = vpop.eup %2277 }
 0x917   :  { %1710 = vadd.xlane.f32.xlu1 %v1709_v18  ;;  %v1016_v21 = vsel %vm487_vm3, %v2278_v19, 0.0 }
 0x91a   :  { %v2280_v20 = vpop.eup %2279 }
 0x91b   :  { %1017 = vadd.xlane.f32.xlu1 %v1016_v21  ;;  %v1533_v22 = vsel %vm487_vm3, %v2280_v20, 0.0 }
 0x91c   :  { %1534 = vadd.xlane.f32.xlu0 %v1533_v22 }
 0x92c   :  { %1363 = vrot.lane.b32.xlu1 %v1270_v23, %s2488_s6 }
 0x930   :  { %1539 = vrot.lane.b32.xlu1 %v1270_v23, %s2489_s30 }
 0x932   :  { %1022 = vrot.lane.b32.xlu0 %v2710_v1, %s2490_s0 }
 0x934   :  { %745 = vrot.lane.b32.xlu1 %v2747_v24, %s2491_s12 }
 0x936   :  { %1715 = vrot.lane.b32.xlu0 %v1270_v23, %s2490_s0 }
 0x93a   :  { %922 = vrot.lane.b32.xlu0 %v917_v59, %s2492_s22 }
 0x9a4   :  { %v1711_v26 = vpop.xlane.xlu1 %1710 }
 0x9a8   :  { %v1018_v28 = vpop.xlane.xlu1 %1017 }
 0x9a9   :  { %2281 = vrcp.f32 %v1018_v28  ;;  %v1535_v29 = vpop.xlane.xlu0 %1534 }
 0x9aa   :  { %2283 = vrcp.f32 %v1191_v27 }
 0x9ab   :  { %2285 = vrcp.f32 %v1359_v25 }
 0x9ac   :  { %v1364_v30 = vpop.permute.xlu1 %1363  ;;  %2287 = vrcp.f32 %v1535_v29 }
 0x9ad   :  { %v1023_v31 = vpop.permute.xlu0 %1022  ;;  %2289 = vrcp.f32 %v1711_v26 }
 0x9ae   :  { %2114 = vmatpush3.msra.mxu1 %v1023_v31 }
 0x9af   :  { %2123 = vmatprep.subr.mxu1 %v2486_v42 }
 0x9b0   :  { %v1540_v1 = vpop.permute.xlu1 %1539 }
 0x9b1   :  { %v1716_v24 = vpop.permute.xlu0 %1715 }
 0x9b3   :  { %v2282_v32 = vpop.eup %2281 }
 0x9b4   :  { %v1020_v33 = vmul.f32 %v2282_v32, %v2278_v19  ;;  %v746_v34 = vpop.permute.xlu1 %745  ;;  %v2284_v35 = vpop.eup %2283 }
 0x9b5   :  { %749 = vst.msk [vmem:[#allocation5] sm:$0xff] %vm748_vm4, %v746_v34  ;;  %v923_v36 = vpop.permute.xlu0 %922  ;;  %v1193_v37 = vmul.f32 %v2284_v35, %v2786_v2  ;;  %v2286_v38 = vpop.eup %2285 }
 0x9b6   :  { %926 = vst.msk [vmem:[#allocation5] sm:$0xff] %vm925_vm5, %v923_v36  ;;  %2116 = vmatmul.mubr.msk.f32.vlgmr.msra.gmra.mrb[16].mxu1 %vm487_vm3, %v1020_v33  ;;  %v1361_v39 = vmul.f32 %v2286_v38, %v2792_v6  ;;  %v2288_v40 = vpop.eup %2287 }
 0x9b7   :  { %2124 = vmatpush3.msra.mxu1 %v1270_v23  ;;  %2125 = vmatprep.mubr.msk.f32.mxu1 %vm2487_vm1, %v2486_v42  ;;  %v1537_v41 = vmul.f32 %v2288_v40, %v2280_v20  ;;  %v2290_v43 = vpop.eup %2289 }
 0x9b8   :  { %2133 = vmatprep.subr.mxu1 %v2486_v42  ;;  %v1713_v44 = vmul.f32 %v2290_v43, %v2796_v17 }
 0x9ba   :  { %2126 = vmatmul.mubr.msk.f32.vlgmr.msra.gmra.mrb[18].mxu1 %vm487_vm3, %v1193_v37 }
 0x9bb   :  { %2134 = vmatpush3.msra.mxu1 %v1364_v30  ;;  %2135 = vmatprep.mubr.msk.f32.mxu1 %vm2487_vm1, %v2486_v42 }
 0x9bc   :  { %2143 = vmatprep.subr.mxu1 %v2486_v42 }
 0x9be   :  { %2136 = vmatmul.mubr.msk.f32.vlgmr.msra.gmra.mrb[20].mxu1 %vm487_vm3, %v1361_v39 }
 0x9bf   :  { %2144 = vmatpush3.msra.mxu1 %v1540_v1  ;;  %2145 = vmatprep.mubr.msk.f32.mxu1 %vm2487_vm1, %v2486_v42 }
 0x9c0   :  { %2153 = vmatprep.subr.mxu1 %v2486_v42 }
 0x9c2   :  { %2146 = vmatmul.mubr.msk.f32.vlgmr.msra.gmra.mrb[22].mxu1 %vm487_vm3, %v1537_v41 }
 0x9c3   :  { %2154 = vmatpush3.msra.mxu1 %v1716_v24  ;;  %2155 = vmatprep.mubr.msk.f32.mxu1 %vm2487_vm1, %v2486_v42  ;;  %v1803_v42 = vld [vmem:[#allocation17 + $0x28] sm:$0xff] }
 0x9c4   :  { %v2233_v56 = vpack.c.bf16 %v1803_v42, %v1802_v53 }
 0x9c6   :  { %2156 = vmatmul.mubr.msk.f32.vlgmr.msra.gmra.mrb[24].mxu1 %vm487_vm3, %v1713_v44  ;;  %2234 = vmatprep.subr.bf16.mxu0 %v2233_v56 }
 0x9c7   :  { %2236 = vmatpush3.bf16.msra.mxu0 %v2233_v56 }
 0x9c8   :  { %2238 = vmatprep.subr.bf16.mxu0 %v2237_v60 }
 0x9cb   :  { %2240 = vmatpush3.bf16.msra.mxu0 %v2237_v60 }
 0xa89   :  { %v1094_v50 = vpop.f32.mrb[16].mxu1 }
 0xa8a   :  { %1099 = vrot.lane.b32.xlu0 %v1094_v50, %s2493_s23  ;;  %v2117_v52 = vpop.f32.mrb[17].mxu1 }
 0xa8d   :  { %v1263_v54 = vpop.f32.mrb[18].mxu1 }
 0xa8e   :  { %1267 = vst.msk [vmem:[#allocation5 + $0x8] sm:$0xff] %vm410_vm2, %v1263_v54  ;;  %v2127_v59 = vpop.f32.mrb[19].mxu1 }
 0xa91   :  { %v1435_v61 = vpop.f32.mrb[20].mxu1 }
 0xa92   :  { %1440 = vrot.lane.b32.xlu1 %v1435_v61, %s2491_s12  ;;  %v2137_v62 = vpop.f32.mrb[21].mxu1 }
 0xa95   :  { %v1611_v63 = vpop.f32.mrb[22].mxu1 }
 0xa96   :  { %1616 = vrot.lane.b32.xlu1 %v1611_v63, %s2492_s22  ;;  %v2147_v0 = vpop.f32.mrb[23].mxu1 }
 0xa99   :  { %v1787_v2 = vpop.f32.mrb[24].mxu1 }
 0xa9a   :  { %1792 = vrot.lane.b32.xlu0 %v1787_v2, %s2493_s23  ;;  %v2157_v3 = vpop.f32.mrb[25].mxu1 }
 0xafc   :  { %v1100_v55 = vpop.permute.xlu0 %1099 }
 0xafd   :  { %1103 = vst.msk [vmem:[#allocation5] sm:$0xff] %vm1102_vm6, %v1100_v55 }
 0xb04   :  { %v1441_v4 = vpop.permute.xlu1 %1440  ;;  %v1796_v5 = vld [vmem:[#allocation5] sm:$0xff] }
 0xb05   :  { %1443 = vst.msk [vmem:[#allocation5 + $0x8] sm:$0xff] %vm748_vm4, %v1441_v4  ;;  %2174 = vmatprep.mubr.msk.f32.mxu0 %vm135_vm0, %v1796_v5 }
 0xb08   :  { %v1617_v6 = vpop.permute.xlu1 %1616 }
 0xb09   :  { %1619 = vst.msk [vmem:[#allocation5 + $0x8] sm:$0xff] %vm925_vm5, %v1617_v6 }
 0xb0c   :  { %v1793_v7 = vpop.permute.xlu0 %1792 }
 0xb0d   :  { %1795 = vst.msk [vmem:[#allocation5 + $0x8] sm:$0xff] %vm1102_vm6, %v1793_v7 }
 0xb14   :  { %v1797_v8 = vld [vmem:[#allocation5 + $0x8] sm:$0xff] }
 0xb15   :  { %2175 = vmatmul.mubr.msk.f32.vlgmr.msra.gmra.mrb[12].mxu0 %vm135_vm0, %v1797_v8 }
 0xbe8   :  { %v2176_v10 = vpop.f32.mrb[12].mxu0 }
 0xbe9   :  { %v1891_v11 = vadd.f32 %v2176_v10, %v1946_v9  ;;  %v1885_v12 = vpop.f32.mrb[13].mxu0 }
 0xbea   :  { %v1886_v13 = vadd.f32 %v1946_v9, %v1885_v12 }
 0xbeb   :  { %1895 = vst.msk [vmem:[#allocation18 + $0x8] sm:$0xff] %vm135_vm0, %v1891_v11 }
 0xbec   :  { %1894 = vst.msk [vmem:[#allocation18] sm:$0xff] %vm135_vm0, %v1886_v13 }
 0xbed   :  { %2456 = shalt.err (!%p2453_p4)
}
 0xbee   :  { %s2457_s28 = scalar_lea.hbm %s2867_s8, 256 }
 0xbef   :  { %p2458_p5 = scmp.ne.s32.totalorder %s2867_s8, %s2457_s28  ;;  %p2461_p6 = scmp.lt.u32.totalorder %s2457_s28, %s2867_s8 }
 0xbf1   :  { %p2463_p7 = pnand %p2461_p6, %p2458_p5 }
 0xbf3   :  { %2466 = shalt.err (!%p2463_p7)
}
 0xbf4   :  { %1907 = dma.vmem_to_hbm [thread:$0]  %s1902_s27, 256, %s2867_s8, [#allocation8], %s2479_s17, %s2479_s17, %s2480_s18  }
 0xbf5   :  { %2475 = dma.done.wait [#allocation8], 256  }
 0xbf6   :  { %2476 = vsyncadd [#allocation8], 4294967040 }
 0xbf7   :  { %1911 = vsyncpa [#allocation7], 1 }
 0xbf8   :  { %1912 = vsyncpa [#allocation10], 1 }
 0xbf9   :  { %1913 = vsyncpa [#allocation13], 1 }
 0xbfa   :  { %1914 = vsyncpa [#allocation16], 1 }
 0xbfb   :  { %1915 = vsyncpa [#allocation8], 1 }

</bundles_post_ra>
